<compile_context>
chip_gen: v7x
topology: tpu7x:2x2x1
jax: 0.10.0
libtpu: 0.0.40
codegen_flags: <defaults>
</compile_context>

<pallas_src>
import functools

import jax
import jax.numpy as jnp
from jax.experimental import pallas as pl
from jax.experimental.pallas import tpu as pltpu

_SUBLANE = 8     # f32 sublane tile
_LANE = 128      # lane tile
_MAX_TILE_B = 256  # MXU M-dim target for large batches


def _round_up(n, m):
    return ((n + m - 1) // m) * m


def _pad2d(a, rows, cols):
    r, c = a.shape
    if r == rows and c == cols:
        return a
    return jnp.pad(a, ((0, rows - r), (0, cols - c)))


# --------------------------------------------------------------------------- #
# Kernel body: whole layer stack, activations stay in vregs between layers.
# refs = (x_ref, w0_ref, b0_ref, w1_ref, b1_ref, ..., o_ref)
#   x  : bf16 (TILE_B, d0_p)          activation tile
#   w_i: bf16 (d_i_p, d_{i+1}_p)      VMEM-resident weight (constant block)
#   b_i: f32  (1, d_{i+1}_p)          bias row
#   o  : f32  (TILE_B, d_last_p)
# --------------------------------------------------------------------------- #
def _mlp_fused_kernel(*refs, num_layers, final_relu_layer):
    x_ref, o_ref = refs[0], refs[-1]
    h = x_ref[...]                                        # bf16
    if final_relu_layer > 0:                              # ReLU before Linear_0
        h = jnp.maximum(h, 0.0)
    acc = None
    for i in range(num_layers):
        w_ref = refs[1 + 2 * i]
        b_ref = refs[2 + 2 * i]
        acc = jnp.dot(h, w_ref[...],
                      preferred_element_type=jnp.float32) + b_ref[...]  # f32
        if i + 1 < num_layers:
            if i + 1 < final_relu_layer:                  # ReLU before next Linear
                acc = jnp.maximum(acc, 0.0)               # f32 VPU (v5e-safe)
            h = acc.astype(jnp.bfloat16)                  # single cast for MXU
    o_ref[...] = acc.astype(o_ref.dtype)


# --------------------------------------------------------------------------- #
# Parameter init + one-time staging (pad to lane tiles, cast weights to bf16).
# --------------------------------------------------------------------------- #
def init_mlp_params(key, layer_sizes, dtype=jnp.float32):
    """Mirrors nn.Linear shapes; weight stored transposed as (in, out)."""
    params = []
    for i in range(len(layer_sizes) - 1):
        in_f, out_f = int(layer_sizes[i]), int(layer_sizes[i + 1])
        key, kw, kb = jax.random.split(key, 3)
        bound = 1.0 / jnp.sqrt(in_f)
        w = jax.random.uniform(kw, (in_f, out_f), dtype, -bound, bound)
        b = jax.random.uniform(kb, (1, out_f), dtype, -bound, bound)
        params.append((w, b))
    return params


def stage_mlp_params(params):
    """Pad/cast parameters ONCE; returns (staged_list, dims, dims_p)."""
    dims = [int(params[0][0].shape[0])] + [int(w.shape[1]) for (w, _) in params]
    dims_p = [_round_up(max(d, _LANE), _LANE) for d in dims]
    staged = []
    for i, (w, b) in enumerate(params):
        w_p = _pad2d(w.astype(jnp.float32), dims_p[i], dims_p[i + 1])
        b_p = _pad2d(jnp.reshape(b, (1, -1)).astype(jnp.float32), 1, dims_p[i + 1])
        staged.append((jax.device_put(w_p.astype(jnp.bfloat16)),
                       jax.device_put(b_p)))
    return staged, tuple(dims), tuple(dims_p)


# --------------------------------------------------------------------------- #
# Forward pass: one pallas_call over a batch grid with VMEM-resident weights.
# --------------------------------------------------------------------------- #
def mlp_forward(x, staged, final_relu=False, tile_b=None):
    staged_params, dims, dims_p = staged
    num_layers = len(staged_params)
    final_relu_layer = num_layers if final_relu else num_layers - 1

    batch, in_f = x.shape
    assert in_f == dims[0], "input feature dim mismatch"

    batch_p = _round_up(max(batch, _SUBLANE), _SUBLANE)
    if tile_b is None:
        tile_b = batch_p if batch_p <= _MAX_TILE_B else _MAX_TILE_B
    tile_b = _round_up(int(tile_b), _SUBLANE)
    batch_p = _round_up(batch_p, tile_b)
    grid = (batch_p // tile_b,)

    d0_p, out_p = dims_p[0], dims_p[-1]

    # Activation staged as bf16 (what the MXU consumes) -> half the input DMA.
    x_p = _pad2d(x.astype(jnp.bfloat16), batch_p, d0_p)

    flat_inputs = [x_p]
    in_specs = [pl.BlockSpec((tile_b, d0_p), lambda i: (i, 0))]
    for (w_p, b_p) in staged_params:
        flat_inputs.append(w_p)
        flat_inputs.append(b_p)
        # Constant index_map -> weights/biases DMA'd once, stay VMEM-resident.
        in_specs.append(pl.BlockSpec(w_p.shape, lambda i: (0, 0)))
        in_specs.append(pl.BlockSpec(b_p.shape, lambda i: (0, 0)))

    flops = 2 * batch_p * sum(dims_p[i] * dims_p[i + 1] for i in range(num_layers))
    bytes_accessed = (sum(int(a.size) * a.dtype.itemsize for a in flat_inputs)
                      + batch_p * out_p * 4)

    # Explicit VMEM budget: resident weights + double-buffered act/out tiles.
    weight_bytes = sum(int(w.size) * w.dtype.itemsize + int(b.size) * b.dtype.itemsize
                       for (w, b) in staged_params)
    act_bytes = tile_b * d0_p * 2 + tile_b * out_p * 4
    need = 2 * (weight_bytes + act_bytes) + (4 << 20)      # headroom for scratch
    try:
        vmem_cap = int(pltpu.get_tpu_info().vmem_capacity_bytes)
    except Exception:
        vmem_cap = 64 << 20                                # v7x-safe fallback
    vmem_budget = int(min(max(need, 32 << 20), int(vmem_cap * 0.9)))

    kernel = functools.partial(_mlp_fused_kernel,
                               num_layers=num_layers,
                               final_relu_layer=final_relu_layer)

    out_padded = pl.pallas_call(
        kernel,
        out_shape=jax.ShapeDtypeStruct((batch_p, out_p), jnp.float32),
        grid=grid,
        in_specs=in_specs,
        out_specs=pl.BlockSpec((tile_b, out_p), lambda i: (i, 0)),
        compiler_params=pltpu.CompilerParams(
            dimension_semantics=("parallel",),
            vmem_limit_bytes=vmem_budget),
        cost_estimate=pl.CostEstimate(flops=flops, transcendentals=0,
                                      bytes_accessed=bytes_accessed),
    )(*flat_inputs)

    # Slice the real result back out of the padded slab.
    return out_padded[:batch, :dims[-1]]


# --------------------------------------------------------------------------- #
# Plain-JAX reference (bf16_matmul=True mirrors the kernel's precision policy).
# --------------------------------------------------------------------------- #
def mlp_forward_ref(x, params, final_relu=False, bf16_matmul=True):
    num_layers = len(params)
    final_relu_layer = num_layers if final_relu else num_layers - 1
    h = x.astype(jnp.float32)
    for i, (w, b) in enumerate(params):
        if i < final_relu_layer:
            h = jnp.maximum(h, 0.0)
        if bf16_matmul:
            h = jnp.dot(h.astype(jnp.bfloat16), w.astype(jnp.bfloat16),
                        preferred_element_type=jnp.float32) + b.reshape(1, -1)
        else:
            h = h @ w + b.reshape(1, -1)
    return h


def _check(x, params, staged, final_relu, tile_b=None):
    out = jax.block_until_ready(mlp_forward(x, staged, final_relu, tile_b=tile_b))
    ref_bf16 = mlp_forward_ref(x, params, final_relu, bf16_matmul=True)
    ref_f32 = mlp_forward_ref(x, params, final_relu, bf16_matmul=False)
    assert out.shape == ref_f32.shape, (out.shape, ref_f32.shape)
    assert jnp.allclose(out, ref_bf16, atol=5e-3, rtol=5e-3), "mismatch vs bf16 ref"
    assert jnp.allclose(out, ref_f32, atol=8e-2, rtol=8e-2), "mismatch vs f32 ref"


if __name__ == "__main__":
    key = jax.random.PRNGKey(0)

    # Main test: 3-Linear MLP, tiny batch.
    layer_sizes = [32, 64, 48, 16]
    batch = 2
    k_in, k_params, k_in2, k_params2 = jax.random.split(key, 4)
    x = jax.random.normal(k_in, (batch, layer_sizes[0]), jnp.float32)
    params = init_mlp_params(k_params, layer_sizes)
    staged = stage_mlp_params(params)
    _check(x, params, staged, final_relu=False)
    _check(x, params, staged, final_relu=True)

    # Exercise the batch grid (>1 grid step) with a small tile.
    x_big = jax.random.normal(k_in2, (20, layer_sizes[0]), jnp.float32)
    _check(x_big, params, staged, final_relu=False, tile_b=8)

    # Single-layer edge case: final_relu=False -> no ReLU at all (matches PyTorch).
    layer_sizes_1 = [32, 16]
    params_1 = init_mlp_params(k_params2, layer_sizes_1)
    staged_1 = stage_mlp_params(params_1)
    x_1 = jax.random.normal(k_in, (batch, layer_sizes_1[0]), jnp.float32)
    _check(x_1, params_1, staged_1, final_relu=False)

    print("KERNEL_OK")
</pallas_src>

<mosaic_0001>
module attributes {stable_mosaic.version = 11 : i64} {
  func.func @_mlp_fused_kernel(%arg0: i32, %arg1: memref<8x128xbf16, #tpu.memory_space<vmem>>, %arg2: memref<128x128xbf16, #tpu.memory_space<vmem>>, %arg3: memref<1x128xf32, #tpu.memory_space<vmem>>, %arg4: memref<128x128xbf16, #tpu.memory_space<vmem>>, %arg5: memref<1x128xf32, #tpu.memory_space<vmem>>, %arg6: memref<128x128xbf16, #tpu.memory_space<vmem>>, %arg7: memref<1x128xf32, #tpu.memory_space<vmem>>, %arg8: memref<8x128xf32, #tpu.memory_space<vmem>>) attributes {dimension_semantics = [#tpu.dimension_semantics<parallel>], iteration_bounds = array<i64: 1>, scalar_prefetch = 0 : i64, scratch_operands = 0 : i64, tpu.core_type = #tpu.core_type<tc>, window_params = [{transform_indices = @transform_0, window_bounds = array<i64: 8, 128>}, {pipeline_mode = #tpu.pipeline_mode<synchronous>, transform_indices = @transform_1, window_bounds = array<i64: 128, 128>}, {pipeline_mode = #tpu.pipeline_mode<synchronous>, transform_indices = @transform_2, window_bounds = array<i64: 1, 128>}, {pipeline_mode = #tpu.pipeline_mode<synchronous>, transform_indices = @transform_3, window_bounds = array<i64: 128, 128>}, {pipeline_mode = #tpu.pipeline_mode<synchronous>, transform_indices = @transform_4, window_bounds = array<i64: 1, 128>}, {pipeline_mode = #tpu.pipeline_mode<synchronous>, transform_indices = @transform_5, window_bounds = array<i64: 128, 128>}, {pipeline_mode = #tpu.pipeline_mode<synchronous>, transform_indices = @transform_6, window_bounds = array<i64: 1, 128>}, {transform_indices = @transform_7, window_bounds = array<i64: 8, 128>}]} {
    %c0 = arith.constant 0 : index
    %c0_0 = arith.constant 0 : index
    %0 = vector.load %arg1[%c0, %c0_0] : memref<8x128xbf16, #tpu.memory_space<vmem>>, vector<8x128xbf16>
    %cst = arith.constant 0.000000e+00 : bf16
    %1 = vector.broadcast %cst : bf16 to vector<8x128xbf16>
    %2 = arith.maximumf %0, %1 : vector<8x128xbf16>
    %c0_1 = arith.constant 0 : index
    %c0_2 = arith.constant 0 : index
    %3 = vector.load %arg2[%c0_1, %c0_2] : memref<128x128xbf16, #tpu.memory_space<vmem>>, vector<128x128xbf16>
    %cst_3 = arith.constant dense<0.000000e+00> : vector<8x128xf32>
    %4 = tpu.matmul %2, %3, %cst_3 {dimension_numbers = #tpu.dot_dimension_numbers<[1], [0], [0], [1], [0, 0, 1, 1], [], []>} : vector<8x128xbf16>, vector<128x128xbf16>, vector<8x128xf32> -> vector<8x128xf32>
    %c0_4 = arith.constant 0 : index
    %c0_5 = arith.constant 0 : index
    %5 = vector.load %arg3[%c0_4, %c0_5] : memref<1x128xf32, #tpu.memory_space<vmem>>, vector<1x128xf32>
    %6 = vector.broadcast %5 : vector<1x128xf32> to vector<8x128xf32>
    %7 = arith.addf %4, %6 : vector<8x128xf32>
    %cst_6 = arith.constant 0.000000e+00 : f32
    %8 = vector.broadcast %cst_6 : f32 to vector<8x128xf32>
    %9 = arith.maximumf %7, %8 : vector<8x128xf32>
    %10 = arith.truncf %9 : vector<8x128xf32> to vector<8x128xbf16>
    %c0_7 = arith.constant 0 : index
    %c0_8 = arith.constant 0 : index
    %11 = vector.load %arg4[%c0_7, %c0_8] : memref<128x128xbf16, #tpu.memory_space<vmem>>, vector<128x128xbf16>
    %cst_9 = arith.constant dense<0.000000e+00> : vector<8x128xf32>
    %12 = tpu.matmul %10, %11, %cst_9 {dimension_numbers = #tpu.dot_dimension_numbers<[1], [0], [0], [1], [0, 0, 1, 1], [], []>} : vector<8x128xbf16>, vector<128x128xbf16>, vector<8x128xf32> -> vector<8x128xf32>
    %c0_10 = arith.constant 0 : index
    %c0_11 = arith.constant 0 : index
    %13 = vector.load %arg5[%c0_10, %c0_11] : memref<1x128xf32, #tpu.memory_space<vmem>>, vector<1x128xf32>
    %14 = vector.broadcast %13 : vector<1x128xf32> to vector<8x128xf32>
    %15 = arith.addf %12, %14 : vector<8x128xf32>
    %16 = arith.truncf %15 : vector<8x128xf32> to vector<8x128xbf16>
    %c0_12 = arith.constant 0 : index
    %c0_13 = arith.constant 0 : index
    %17 = vector.load %arg6[%c0_12, %c0_13] : memref<128x128xbf16, #tpu.memory_space<vmem>>, vector<128x128xbf16>
    %cst_14 = arith.constant dense<0.000000e+00> : vector<8x128xf32>
    %18 = tpu.matmul %16, %17, %cst_14 {dimension_numbers = #tpu.dot_dimension_numbers<[1], [0], [0], [1], [0, 0, 1, 1], [], []>} : vector<8x128xbf16>, vector<128x128xbf16>, vector<8x128xf32> -> vector<8x128xf32>
    %c0_15 = arith.constant 0 : index
    %c0_16 = arith.constant 0 : index
    %19 = vector.load %arg7[%c0_15, %c0_16] : memref<1x128xf32, #tpu.memory_space<vmem>>, vector<1x128xf32>
    %20 = vector.broadcast %19 : vector<1x128xf32> to vector<8x128xf32>
    %21 = arith.addf %18, %20 : vector<8x128xf32>
    %c0_17 = arith.constant 0 : index
    %c0_18 = arith.constant 0 : index
    %22 = vector.load %arg8[%c0_17, %c0_18] : memref<8x128xf32, #tpu.memory_space<vmem>>, vector<8x128xf32>
    tpu.vector_store %arg8[%c0_17, %c0_18], %21 {strides = array<i32>} : memref<8x128xf32, #tpu.memory_space<vmem>>, vector<8x128xf32>,
    return
  }
  func.func @transform_0(%arg0: i32) -> (i32, i32) {
    %c0_i32 = arith.constant 0 : i32
    %c0_i32_0 = arith.constant 0 : i32
    return %arg0, %c0_i32 : i32, i32
  }
  func.func @transform_1(%arg0: i32) -> (i32, i32) {
    %c0_i32 = arith.constant 0 : i32
    %c0_i32_0 = arith.constant 0 : i32
    %c0_i32_1 = arith.constant 0 : i32
    return %c0_i32, %c0_i32_0 : i32, i32
  }
  func.func @transform_2(%arg0: i32) -> (i32, i32) {
    %c0_i32 = arith.constant 0 : i32
    %c0_i32_0 = arith.constant 0 : i32
    %c0_i32_1 = arith.constant 0 : i32
    return %c0_i32, %c0_i32_0 : i32, i32
  }
  func.func @transform_3(%arg0: i32) -> (i32, i32) {
    %c0_i32 = arith.constant 0 : i32
    %c0_i32_0 = arith.constant 0 : i32
    %c0_i32_1 = arith.constant 0 : i32
    return %c0_i32, %c0_i32_0 : i32, i32
  }
  func.func @transform_4(%arg0: i32) -> (i32, i32) {
    %c0_i32 = arith.constant 0 : i32
    %c0_i32_0 = arith.constant 0 : i32
    %c0_i32_1 = arith.constant 0 : i32
    return %c0_i32, %c0_i32_0 : i32, i32
  }
  func.func @transform_5(%arg0: i32) -> (i32, i32) {
    %c0_i32 = arith.constant 0 : i32
    %c0_i32_0 = arith.constant 0 : i32
    %c0_i32_1 = arith.constant 0 : i32
    return %c0_i32, %c0_i32_0 : i32, i32
  }
  func.func @transform_6(%arg0: i32) -> (i32, i32) {
    %c0_i32 = arith.constant 0 : i32
    %c0_i32_0 = arith.constant 0 : i32
    %c0_i32_1 = arith.constant 0 : i32
    return %c0_i32, %c0_i32_0 : i32, i32
  }
  func.func @transform_7(%arg0: i32) -> (i32, i32) {
    %c0_i32 = arith.constant 0 : i32
    %c0_i32_0 = arith.constant 0 : i32
    return %arg0, %c0_i32 : i32, i32
  }
}

</mosaic_0001>

<bundles_post_ra>
// kernel: tpu_custom_call.1
= control target key start
LH: loop header
LB: loop body
LE: loop exit
PB: predicated region body
PF: predicated region fallthrough
CT: control target
= control target key end

     0   :  { %12 = vsyncpa [#allocation3], 0  ;;  %s861_s0 = inlined_call_operand.hbm [shape: bf16[8,128], index: 0, kind: input, shape index: {}]   ;;  %s862_s1 = inlined_call_operand.hbm [shape: bf16[128,128], index: 1, kind: input, shape index: {}]   ;;  %s863_s2 = inlined_call_operand.vmem [shape: f32[1,128], index: 2, kind: input, shape index: {}]   ;;  %s864_s3 = inlined_call_operand.hbm [shape: bf16[128,128], index: 3, kind: input, shape index: {}]   ;;  %s865_s4 = inlined_call_operand.vmem [shape: f32[1,128], index: 4, kind: input, shape index: {}]   ;;  %s866_s5 = inlined_call_operand.hbm [shape: bf16[128,128], index: 5, kind: input, shape index: {}]   ;;  %s867_s6 = inlined_call_operand.vmem [shape: f32[1,128], index: 6, kind: input, shape index: {}]   ;;  %s868_s7 = inlined_call_operand.hbm [shape: f32[8,128], index: 7, kind: output, shape index: {}]  }
   0x1   :  { %13 = vsyncpa [#allocation6], 0 }
   0x2   :  { %14 = vsyncpa [#allocation9], 0 }
   0x3   :  { %15 = vsyncpa [#allocation4], 0  ;;  %s703_s24 = smov [#allocation5]   ;;  %s585_s28 = scalar_lea.hbm %s862_s1, 1024 }
   0x4   :  { %s31_s25 = sshll.u32 %s703_s24, 4  ;;  %p586_p0 = scmp.ne.s32.totalorder %s862_s1, %s585_s28  ;;  %s32_s25 = int_to_ptr.vmem [resolvable:$true] %s31_s25 }
   0x5   :  { %p589_p1 = scmp.lt.u32.totalorder %s585_s28, %s862_s1 }
   0x7   :  { %p591_p2 = pnand %p589_p1, %p586_p0 }
   0x9   :  { %594 = shalt.err (!%p591_p2)
}
   0xa   :  { %s595_s10 = scalar_lea.vmem %s32_s25, 1024  ;;  %p600_p4 = scmp.lt.s32.totalorder %s32_s25, %s32_s25 }
   0xb   :  { %p596_p3 = scmp.ne.s32.totalorder %s32_s25, %s595_s10  ;;  %p601_p5 = scmp.lt.s32.totalorder %s595_s10, %s595_s10 }
   0xd   :  { %p602_p6 = por %p601_p5, %p600_p4 }
   0xf   :  { %p603_p7 = pnand %p602_p6, %p596_p3 }
  0x11   :  { %606 = shalt.err (!%p603_p7)
}
  0x12   :  { %s704_s11 = smov 64   ;;  %s705_s12 = smov 4  }
  0x13   :  { %37 = dma.hbm_to_vmem [thread:$0]  %s862_s1, 1024, %s32_s25, [#allocation6], %s704_s11, %s704_s11, %s705_s12  }
  0x14   :  { %s706_s15 = smov [#allocation2]   ;;  %s707_s17 = smov [#allocation7]  }
  0x15   :  { %s22_s16 = sshll.u32 %s706_s15, 4  ;;  %s45_s18 = sshll.u32 %s707_s17, 4  ;;  %s23_s16 = int_to_ptr.vmem [resolvable:$true] %s22_s16  ;;  %s46_s18 = int_to_ptr.vmem [resolvable:$true] %s45_s18 }
  0x16   :  { %s607_s21 = scalar_lea.hbm %s861_s0, 64 }
  0x17   :  { %p608_p8 = scmp.ne.s32.totalorder %s861_s0, %s607_s21  ;;  %p611_p9 = scmp.lt.u32.totalorder %s607_s21, %s861_s0 }
  0x19   :  { %p613_p10 = pnand %p611_p9, %p608_p8 }
  0x1b   :  { %616 = shalt.err (!%p613_p10)
}
  0x1c   :  { %s617_s1 = scalar_lea.vmem %s23_s16, 64  ;;  %p622_p12 = scmp.lt.s32.totalorder %s23_s16, %s23_s16 }
  0x1d   :  { %p618_p11 = scmp.ne.s32.totalorder %s23_s16, %s617_s1  ;;  %p623_p13 = scmp.lt.s32.totalorder %s617_s1, %s617_s1 }
  0x1f   :  { %p624_p0 = por %p623_p13, %p622_p12 }
  0x21   :  { %p625_p1 = pnand %p624_p0, %p618_p11 }
  0x23   :  { %628 = shalt.err (!%p625_p1)
}
  0x24   :  { %25 = dma.hbm_to_vmem [thread:$0]  %s861_s0, 64, %s23_s16, [#allocation3]  }
  0x25   :  { %s629_s30 = scalar_lea.hbm %s864_s3, 1024 }
  0x26   :  { %p630_p2 = scmp.ne.s32.totalorder %s864_s3, %s629_s30  ;;  %p633_p3 = scmp.lt.u32.totalorder %s629_s30, %s864_s3 }
  0x28   :  { %p635_p4 = pnand %p633_p3, %p630_p2 }
  0x2a   :  { %638 = shalt.err (!%p635_p4)
}
  0x2b   :  { %s639_s14 = scalar_lea.vmem %s46_s18, 1024  ;;  %p644_p6 = scmp.lt.s32.totalorder %s46_s18, %s46_s18 }
  0x2c   :  { %p640_p5 = scmp.ne.s32.totalorder %s46_s18, %s639_s14  ;;  %p645_p7 = scmp.lt.s32.totalorder %s639_s14, %s639_s14 }
  0x2e   :  { %p646_p8 = por %p645_p7, %p644_p6 }
  0x30   :  { %p647_p9 = pnand %p646_p8, %p640_p5 }
  0x32   :  { %650 = shalt.err (!%p647_p9)
}
  0x33   :  { %51 = dma.hbm_to_vmem [thread:$0]  %s864_s3, 1024, %s46_s18, [#allocation6], %s704_s11, %s704_s11, %s705_s12  }
  0x34   :  { %s708_s16 = smov [#allocation8]   ;;  %s651_s21 = scalar_lea.hbm %s866_s5, 1024 }
  0x35   :  { %s59_s17 = sshll.u32 %s708_s16, 4  ;;  %p652_p10 = scmp.ne.s32.totalorder %s866_s5, %s651_s21  ;;  %s60_s17 = int_to_ptr.vmem [resolvable:$true] %s59_s17 }
  0x36   :  { %p655_p11 = scmp.lt.u32.totalorder %s651_s21, %s866_s5 }
  0x38   :  { %p657_p12 = pnand %p655_p11, %p652_p10 }
  0x3a   :  { %660 = shalt.err (!%p657_p12)
}
  0x3b   :  { %s661_s1 = scalar_lea.vmem %s60_s17, 1024  ;;  %p666_p0 = scmp.lt.s32.totalorder %s60_s17, %s60_s17 }
  0x3c   :  { %p662_p13 = scmp.ne.s32.totalorder %s60_s17, %s661_s1  ;;  %p667_p1 = scmp.lt.s32.totalorder %s661_s1, %s661_s1 }
  0x3e   :  { %p668_p2 = por %p667_p1, %p666_p0 }
  0x40   :  { %p669_p3 = pnand %p668_p2, %p662_p13 }
  0x42   :  { %672 = shalt.err (!%p669_p3)
}
  0x43   :  { %65 = dma.hbm_to_vmem [thread:$0]  %s866_s5, 1024, %s60_s17, [#allocation9], %s704_s11, %s704_s11, %s705_s12  }
  0x44   :  { %695 = dma.done.wait [#allocation3], 64  }
  0x45   :  { %696 = vsyncadd [#allocation3], 4294967232 }
  0x46   :  { %697 = dma.done.wait [#allocation6], 2048  }
  0x47   :  { %698 = vsyncadd [#allocation6], 4294965248 }
  0x48   :  { %699 = dma.done.wait [#allocation9], 1024  }
  0x49   :  { %700 = vsyncadd [#allocation9], 4294966272  ;;  %v709_v0 = vmov 0.0   ;;  %vm710_vm0 = vmmov 0   ;;  %v561_v1 = vld [vmem:[#allocation5] sm:$0xff]   ;;  %v562_v2 = vld [vmem:[#allocation5 + $0x8] sm:$0xff]  }
  0x4a   :  { %491 = vmatprep.subr.bf16.mxu0 %v709_v0  ;;  %507 = vmatprep.mubr.msk.bf16.mxu0 %vm710_vm0, %v709_v0  ;;  %v563_v3 = vld [vmem:[#allocation5 + $0x10] sm:$0xff]   ;;  %v569_v4 = vld [vmem:[#allocation7] sm:$0xff]   ;;  %v564_v5 = vld [vmem:[#allocation5 + $0x18] sm:$0xff]   ;;  %v711_v16 = vmov 0   ;;  %s712_s28 = smov [#allocation10]  }
  0x4b   :  { %511 = vmatprep.subr.bf16.mxu1 %v709_v0  ;;  %527 = vmatprep.mubr.msk.bf16.mxu1 %vm710_vm0, %v709_v0  ;;  %v570_v6 = vld [vmem:[#allocation7 + $0x8] sm:$0xff]   ;;  %v565_v7 = vld [vmem:[#allocation5 + $0x20] sm:$0xff]   ;;  %v571_v8 = vld [vmem:[#allocation7 + $0x10] sm:$0xff]   ;;  %s426_s29 = sshll.u32 %s712_s28, 4  ;;  %s427_s29 = int_to_ptr.vmem [resolvable:$true] %s426_s29 }
  0x4c   :  { %492 = vmatpush3.bf16.msra.mxu0 %v561_v1  ;;  %512 = vmatpush3.bf16.msra.mxu1 %v569_v4  ;;  %v566_v9 = vld [vmem:[#allocation5 + $0x28] sm:$0xff]   ;;  %v572_v10 = vld [vmem:[#allocation7 + $0x18] sm:$0xff]   ;;  %v567_v11 = vld [vmem:[#allocation5 + $0x30] sm:$0xff]   ;;  %p678_p5 = scmp.lt.s32.totalorder %s427_s29, %s427_s29 }
  0x4d   :  { %493 = vmatprep.subr.bf16.mxu0 %v709_v0  ;;  %513 = vmatprep.subr.bf16.mxu1 %v709_v0  ;;  %v573_v12 = vld [vmem:[#allocation7 + $0x20] sm:$0xff]   ;;  %v568_v13 = vld [vmem:[#allocation5 + $0x38] sm:$0xff]   ;;  %v574_v15 = vld [vmem:[#allocation7 + $0x28] sm:$0xff]  }
  0x4e   :  { %v81_v14 = vld [vmem:[#allocation2] sm:$0xf]  ;;  %v575_v18 = vld [vmem:[#allocation7 + $0x30] sm:$0xff]   ;;  %v577_v20 = vld [vmem:[#allocation8] sm:$0xff]  }
  0x4f   :  { %v82_v17 = vmax.bf16 %v711_v16, %v81_v14  ;;  %v576_v19 = vld [vmem:[#allocation7 + $0x38] sm:$0xff]   ;;  %v578_v21 = vld [vmem:[#allocation8 + $0x8] sm:$0xff]   ;;  %v579_v22 = vld [vmem:[#allocation8 + $0x10] sm:$0xff]  }
  0x50   :  { %494 = vmatpush3.bf16.msra.mxu0 %v562_v2  ;;  %514 = vmatpush3.bf16.msra.mxu1 %v570_v6  ;;  %v580_v23 = vld [vmem:[#allocation8 + $0x18] sm:$0xff]   ;;  %v581_v24 = vld [vmem:[#allocation8 + $0x20] sm:$0xff]   ;;  %v582_v25 = vld [vmem:[#allocation8 + $0x28] sm:$0xff]  }
  0x51   :  { %495 = vmatprep.subr.bf16.mxu0 %v709_v0  ;;  %515 = vmatprep.subr.bf16.mxu1 %v709_v0  ;;  %v583_v26 = vld [vmem:[#allocation8 + $0x30] sm:$0xff]   ;;  %v437_v27 = vld [vmem:[%s863_s2] ss:$0 sm:$0xff] }
  0x52   :  { %v584_v35 = vld [vmem:[#allocation8 + $0x38] sm:$0xff]  }
  0x53   :  { %v446_v36 = vld [vmem:[%s865_s4] ss:$0 sm:$0xff]  ;;  %s673_s4 = scalar_lea.vmem %s427_s29, 128 }
  0x54   :  { %496 = vmatpush3.bf16.msra.mxu0 %v563_v3  ;;  %516 = vmatpush3.bf16.msra.mxu1 %v571_v8  ;;  %v455_v43 = vld [vmem:[%s867_s6] ss:$0 sm:$0xff]  ;;  %p674_p4 = scmp.ne.s32.totalorder %s427_s29, %s673_s4  ;;  %p679_p6 = scmp.lt.s32.totalorder %s673_s4, %s673_s4 }
  0x55   :  { %497 = vmatprep.subr.bf16.mxu0 %v709_v0  ;;  %517 = vmatprep.subr.bf16.mxu1 %v709_v0 }
  0x56   :  { %p680_p7 = por %p679_p6, %p678_p5 }
  0x58   :  { %498 = vmatpush3.bf16.msra.mxu0 %v564_v5  ;;  %518 = vmatpush3.bf16.msra.mxu1 %v572_v10  ;;  %p681_p8 = pnand %p680_p7, %p674_p4 }
  0x59   :  { %499 = vmatprep.subr.bf16.mxu0 %v709_v0  ;;  %519 = vmatprep.subr.bf16.mxu1 %v709_v0 }
  0x5c   :  { %500 = vmatpush3.bf16.msra.mxu0 %v565_v7  ;;  %520 = vmatpush3.bf16.msra.mxu1 %v573_v12 }
  0x5d   :  { %501 = vmatprep.subr.bf16.mxu0 %v709_v0  ;;  %521 = vmatprep.subr.bf16.mxu1 %v709_v0 }
  0x60   :  { %502 = vmatpush3.bf16.msra.mxu0 %v566_v9  ;;  %522 = vmatpush3.bf16.msra.mxu1 %v574_v15 }
  0x61   :  { %503 = vmatprep.subr.bf16.mxu0 %v709_v0  ;;  %523 = vmatprep.subr.bf16.mxu1 %v709_v0 }
  0x64   :  { %504 = vmatpush3.bf16.msra.mxu0 %v567_v11  ;;  %524 = vmatpush3.bf16.msra.mxu1 %v575_v18 }
  0x65   :  { %505 = vmatprep.subr.bf16.mxu0 %v709_v0  ;;  %525 = vmatprep.subr.bf16.mxu1 %v709_v0 }
  0x68   :  { %506 = vmatpush3.bf16.msra.mxu0 %v568_v13  ;;  %526 = vmatpush3.bf16.msra.mxu1 %v576_v19 }
  0x69   :  { %531 = vmatprep.subr.bf16.mxu0 %v709_v0 }
  0x6b   :  { %508 = vmatmul.mubr.bf16.vlgmr.msra.gmra.mrb[0].mxu0 %v82_v17 }
  0x6c   :  { %547 = vmatprep.mubr.msk.bf16.mxu0 %vm710_vm0, %v709_v0  ;;  %532 = vmatpush3.bf16.msra.mxu0 %v577_v20 }
  0x6d   :  { %533 = vmatprep.subr.bf16.mxu0 %v709_v0 }
  0x70   :  { %534 = vmatpush3.bf16.msra.mxu0 %v578_v21 }
  0x71   :  { %535 = vmatprep.subr.bf16.mxu0 %v709_v0 }
  0x74   :  { %536 = vmatpush3.bf16.msra.mxu0 %v579_v22 }
  0x75   :  { %537 = vmatprep.subr.bf16.mxu0 %v709_v0 }
  0x78   :  { %538 = vmatpush3.bf16.msra.mxu0 %v580_v23 }
  0x79   :  { %539 = vmatprep.subr.bf16.mxu0 %v709_v0 }
  0x7c   :  { %540 = vmatpush3.bf16.msra.mxu0 %v581_v24 }
  0x7d   :  { %541 = vmatprep.subr.bf16.mxu0 %v709_v0 }
  0x80   :  { %542 = vmatpush3.bf16.msra.mxu0 %v582_v25 }
  0x81   :  { %543 = vmatprep.subr.bf16.mxu0 %v709_v0 }
  0x84   :  { %544 = vmatpush3.bf16.msra.mxu0 %v583_v26 }
  0x85   :  { %545 = vmatprep.subr.bf16.mxu0 %v709_v0 }
  0x88   :  { %546 = vmatpush3.bf16.msra.mxu0 %v584_v35 }
 0x13e   :  { %v188_v28 = vpop.f32.mrb[0].mxu0 }
 0x13f   :  { %v189_v29 = vadd.f32 %v437_v27, %v188_v28  ;;  %v509_v30 = vpop.f32.mrb[1].mxu0 }
 0x140   :  { %v191_v31 = vpop.f32.mrb[2].mxu0 }
 0x141   :  { %v194_v32 = vmax.f32 %v189_v29, 0.0  ;;  %v510_v33 = vpop.f32.mrb[3].mxu0 }
 0x143   :  { %v195_v34 = vpack.c.bf16 %v194_v32, %v194_v32 }
 0x145   :  { %528 = vmatmul.mubr.bf16.vlgmr.msra.gmra.mrb[0].mxu1 %v195_v34 }
 0x218   :  { %v301_v37 = vpop.f32.mrb[0].mxu1 }
 0x219   :  { %v302_v38 = vadd.f32 %v446_v36, %v301_v37  ;;  %v529_v39 = vpop.f32.mrb[1].mxu1 }
 0x21a   :  { %v304_v40 = vpop.f32.mrb[2].mxu1 }
 0x21b   :  { %v307_v41 = vpack.c.bf16 %v302_v38, %v302_v38  ;;  %v530_v42 = vpop.f32.mrb[3].mxu1 }
 0x21d   :  { %548 = vmatmul.mubr.bf16.vlgmr.msra.gmra.mrb[4].mxu0 %v307_v41 }
 0x2f0   :  { %v413_v44 = vpop.f32.mrb[4].mxu0 }
 0x2f1   :  { %v414_v45 = vadd.f32 %v455_v43, %v413_v44  ;;  %v549_v46 = vpop.f32.mrb[5].mxu0 }
 0x2f2   :  { %v416_v47 = vpop.f32.mrb[6].mxu0 }
 0x2f3   :  { %419 = vst [vmem:[#allocation10] sm:$0xff] %v414_v45  ;;  %v550_v48 = vpop.f32.mrb[7].mxu0 }
 0x2f4   :  { %684 = shalt.err (!%p681_p8)
}
 0x2f5   :  { %s685_s6 = scalar_lea.hbm %s868_s7, 128 }
 0x2f6   :  { %p686_p9 = scmp.ne.s32.totalorder %s868_s7, %s685_s6  ;;  %p689_p10 = scmp.lt.u32.totalorder %s685_s6, %s868_s7 }
 0x2f8   :  { %p691_p11 = pnand %p689_p10, %p686_p9 }
 0x2fa   :  { %694 = shalt.err (!%p691_p11)
}
 0x2fb   :  { %429 = dma.vmem_to_hbm [thread:$0]  %s427_s29, 128, %s868_s7, [#allocation4]  }
 0x2fc   :  { %701 = dma.done.wait [#allocation4], 128  }
 0x2fd   :  { %702 = vsyncadd [#allocation4], 4294967168 }
 0x2fe   :  { %433 = vsyncpa [#allocation3], 1 }
 0x2ff   :  { %434 = vsyncpa [#allocation6], 1 }
 0x300   :  { %435 = vsyncpa [#allocation9], 1 }
 0x301   :  { %436 = vsyncpa [#allocation4], 1 }

</bundles_post_ra>
